<compile_context>
chip_gen: v7x
topology: tpu7x:2x2x1
jax: 0.10.0
libtpu: 0.0.40
codegen_flags: <defaults>
</compile_context>

<pallas_src>
import functools

import jax
import jax.numpy as jnp
from jax.experimental import pallas as pl
from jax.experimental.pallas import tpu as pltpu

_EPS = 1e-5


def _layernorm_kernel(x_ref, w_ref, b_ref, o_ref, *, inv_c):
    """Plain path: one logical row per physical row (block = (T, C))."""
    x = x_ref[...].astype(jnp.float32)                       # (T, C)
    s = jnp.sum(x, axis=-1, keepdims=True)                   # one traversal:
    ss = jnp.sum(x * x, axis=-1, keepdims=True)              # sum and sum of squares
    mu = s * inv_c
    var = jnp.maximum(ss * inv_c - mu * mu, 0.0)              # unbiased=False
    rstd = jax.lax.rsqrt(var + _EPS)
    y = (x - mu) * rstd * w_ref[...].astype(jnp.float32) + b_ref[...].astype(jnp.float32)
    o_ref[...] = y.astype(o_ref.dtype)


def _layernorm_packed_kernel(x_ref, w_ref, b_ref, seg_ref, segt_ref, o_ref, *, inv_c):
    """Lane-packed path: G = 128 // C logical rows per 128-lane physical row.

    seg_ref  : (G*C, G) one-hot lane->segment matrix (segment sums via MXU)
    segt_ref : (G, G*C) transpose (segment value -> broadcast back to its C lanes)
    """
    x = x_ref[...].astype(jnp.float32)                       # (T, G*C)
    seg = seg_ref[...]                                       # (G*C, G) f32 0/1
    seg_t = segt_ref[...]                                    # (G, G*C) f32 0/1
    hi = jax.lax.Precision.HIGHEST
    s = jnp.dot(x, seg, precision=hi, preferred_element_type=jnp.float32)       # (T, G)
    ss = jnp.dot(x * x, seg, precision=hi, preferred_element_type=jnp.float32)  # (T, G)
    mu = s * inv_c
    var = jnp.maximum(ss * inv_c - mu * mu, 0.0)
    rstd = jax.lax.rsqrt(var + _EPS)
    mu_f = jnp.dot(mu, seg_t, precision=hi, preferred_element_type=jnp.float32)     # (T, G*C)
    rstd_f = jnp.dot(rstd, seg_t, precision=hi, preferred_element_type=jnp.float32)  # (T, G*C)
    y = (x - mu_f) * rstd_f * w_ref[...].astype(jnp.float32) + b_ref[...].astype(jnp.float32)
    o_ref[...] = y.astype(o_ref.dtype)


def with_bias_layernorm(x, weight, bias, *, tile_rows=None,
                        target_block_bytes=2 * 1024 * 1024):
    """LayerNorm over the last dimension with affine weight/bias (eps=1e-5)."""
    orig_shape = x.shape
    C = int(orig_shape[-1])
    x2d = x.reshape(-1, C)
    N = x2d.shape[0]

    # Lane packing: when C < 128 and it divides 128, pack G rows into one
    # 128-lane physical row so loads/stores are lane-dense (unmasked vst).
    G = 1
    if C < 128 and (128 % C == 0) and (N % (128 // C) == 0):
        G = 128 // C
    width = G * C
    rows = N // G

    xw = x2d.reshape(rows, width)                 # contiguous reshape: no copy
    w_row = jnp.tile(weight.reshape(-1).astype(jnp.float32), G).reshape(1, width)
    b_row = jnp.tile(bias.reshape(-1).astype(jnp.float32), G).reshape(1, width)

    # Pick tile_rows so one input block is ~target_block_bytes (big DMAs that
    # saturate HBM BW) while staying well inside every generation's scoped VMEM
    # (double-buffered in+out ~= 4 * block). Round to a multiple of 8 sublanes.
    itemsize = jnp.dtype(x.dtype).itemsize
    if tile_rows is None:
        tr = target_block_bytes // max(1, width * itemsize)
        tr = (tr // 8) * 8
        tile_rows = int(max(8, min(tr, 4096)))
    rows_ceil8 = ((rows + 7) // 8) * 8
    tile_rows = int(max(8, min(int(tile_rows), rows_ceil8)))

    grid = (pl.cdiv(rows, tile_rows),)            # partial last block is masked by Pallas
    out_sds = jax.ShapeDtypeStruct((rows, width), x.dtype)
    compiler_params = pltpu.CompilerParams(
        dimension_semantics=("parallel",),        # shard row-grid across v7x's 2 TCs
        vmem_limit_bytes=32 * 1024 * 1024,        # safe headroom on v5e/v6e/v7x
    )

    x_spec = pl.BlockSpec((tile_rows, width), lambda i: (i, 0))
    o_spec = pl.BlockSpec((tile_rows, width), lambda i: (i, 0))
    const_spec = pl.BlockSpec((1, width), lambda i: (0, 0))   # resident across grid

    if G > 1:
        lane = jnp.arange(width, dtype=jnp.int32)
        seg = (lane[:, None] // C == jnp.arange(G, dtype=jnp.int32)[None, :]).astype(jnp.float32)
        seg_t = jnp.transpose(seg)
        kernel = functools.partial(_layernorm_packed_kernel, inv_c=1.0 / C)
        out = pl.pallas_call(
            kernel,
            out_shape=out_sds,
            grid_spec=pltpu.PrefetchScalarGridSpec(
                num_scalar_prefetch=0,
                grid=grid,
                in_specs=[
                    x_spec,
                    const_spec,
                    const_spec,
                    pl.BlockSpec((width, G), lambda i: (0, 0)),
                    pl.BlockSpec((G, width), lambda i: (0, 0)),
                ],
                out_specs=o_spec,
            ),
            compiler_params=compiler_params,
        )(xw, w_row, b_row, seg, seg_t)
    else:
        # TODO(synk): for C not a multiple of 128 (and not dividing 128), lanes beyond C
        # are masked; a general lane-repacking path would need a gather/scatter layout.
        kernel = functools.partial(_layernorm_kernel, inv_c=1.0 / C)
        out = pl.pallas_call(
            kernel,
            out_shape=out_sds,
            grid_spec=pltpu.PrefetchScalarGridSpec(
                num_scalar_prefetch=0,
                grid=grid,
                in_specs=[x_spec, const_spec, const_spec],
                out_specs=o_spec,
            ),
            compiler_params=compiler_params,
        )(xw, w_row, b_row)

    return out.reshape(orig_shape)


def _reference(x, weight, bias):
    mu = jnp.mean(x, axis=-1, keepdims=True)
    var = jnp.mean((x - mu) ** 2, axis=-1, keepdims=True)
    return (x - mu) / jnp.sqrt(var + _EPS) * weight + bias


if __name__ == "__main__":
    key = jax.random.PRNGKey(0)
    k1, k2, k3, k4, k5, k6 = jax.random.split(key, 6)

    def check(x, weight, bias, **kw):
        out = jax.block_until_ready(with_bias_layernorm(x, weight, bias, **kw))
        ref = _reference(x, weight, bias)
        assert out.shape == x.shape
        assert jnp.allclose(out, ref, atol=1e-4, rtol=1e-4), (
            f"mismatch vs reference for shape {x.shape}")

    # 1) Primary small case (normalized_shape = 32): packed lane-dense path.
    C = 32
    x = jax.random.normal(k1, (2, 8, C), dtype=jnp.float32)
    check(x, jnp.ones((C,), jnp.float32), jnp.zeros((C,), jnp.float32))

    # 2) Packed path, multi-step grid with a partial last block + nontrivial affine.
    C = 32
    x = jax.random.normal(k2, (2, 40, C), dtype=jnp.float32)
    w = jax.random.normal(k3, (C,), dtype=jnp.float32)
    b = jax.random.normal(k4, (C,), dtype=jnp.float32)
    check(x, w, b, tile_rows=8)

    # 3) Plain path, lane-dense C (multiple of 128).
    C = 256
    x = jax.random.normal(k5, (3, 5, C), dtype=jnp.float32)
    check(x, jnp.full((C,), 0.5, jnp.float32), jnp.full((C,), 0.1, jnp.float32))

    # 4) Plain fallback (C does not divide 128), multi-step grid, partial block.
    C = 48
    x = jax.random.normal(k6, (4, 9, C), dtype=jnp.float32)
    check(x, jnp.ones((C,), jnp.float32), jnp.zeros((C,), jnp.float32), tile_rows=16)

    print("KERNEL_OK")
</pallas_src>

<mosaic_0001>
module attributes {stable_mosaic.version = 11 : i64} {
  func.func @_layernorm_packed_kernel(%arg0: i32, %arg1: memref<8x128xf32, #tpu.memory_space<vmem>>, %arg2: memref<1x128xf32, #tpu.memory_space<vmem>>, %arg3: memref<1x128xf32, #tpu.memory_space<vmem>>, %arg4: memref<128x4xf32, #tpu.memory_space<vmem>>, %arg5: memref<4x128xf32, #tpu.memory_space<vmem>>, %arg6: memref<8x128xf32, #tpu.memory_space<vmem>>) attributes {dimension_semantics = [#tpu.dimension_semantics<parallel>], iteration_bounds = array<i64: 1>, scalar_prefetch = 0 : i64, scratch_operands = 0 : i64, tpu.core_type = #tpu.core_type<tc>, window_params = [{transform_indices = @transform_0, window_bounds = array<i64: 8, 128>}, {pipeline_mode = #tpu.pipeline_mode<synchronous>, transform_indices = @transform_1, window_bounds = array<i64: 1, 128>}, {pipeline_mode = #tpu.pipeline_mode<synchronous>, transform_indices = @transform_2, window_bounds = array<i64: 1, 128>}, {pipeline_mode = #tpu.pipeline_mode<synchronous>, transform_indices = @transform_3, window_bounds = array<i64: 128, 4>}, {pipeline_mode = #tpu.pipeline_mode<synchronous>, transform_indices = @transform_4, window_bounds = array<i64: 4, 128>}, {transform_indices = @transform_5, window_bounds = array<i64: 8, 128>}]} {
    %c0 = arith.constant 0 : index
    %c0_0 = arith.constant 0 : index
    %0 = vector.load %arg1[%c0, %c0_0] : memref<8x128xf32, #tpu.memory_space<vmem>>, vector<8x128xf32>
    %c0_1 = arith.constant 0 : index
    %c0_2 = arith.constant 0 : index
    %1 = vector.load %arg4[%c0_1, %c0_2] : memref<128x4xf32, #tpu.memory_space<vmem>>, vector<128x4xf32>
    %c0_3 = arith.constant 0 : index
    %c0_4 = arith.constant 0 : index
    %2 = vector.load %arg5[%c0_3, %c0_4] : memref<4x128xf32, #tpu.memory_space<vmem>>, vector<4x128xf32>
    %cst = arith.constant dense<0.000000e+00> : vector<8x4xf32>
    %3 = tpu.matmul %0, %1, %cst {dimension_numbers = #tpu.dot_dimension_numbers<[1], [0], [0], [1], [0, 0, 1, 1], [], []>, precision = #tpu.contract_precision<fp32>} : vector<8x128xf32>, vector<128x4xf32>, vector<8x4xf32> -> vector<8x4xf32>
    %4 = arith.mulf %0, %0 : vector<8x128xf32>
    %cst_5 = arith.constant dense<0.000000e+00> : vector<8x4xf32>
    %5 = tpu.matmul %4, %1, %cst_5 {dimension_numbers = #tpu.dot_dimension_numbers<[1], [0], [0], [1], [0, 0, 1, 1], [], []>, precision = #tpu.contract_precision<fp32>} : vector<8x128xf32>, vector<128x4xf32>, vector<8x4xf32> -> vector<8x4xf32>
    %cst_6 = arith.constant 3.125000e-02 : f32
    %6 = vector.broadcast %cst_6 : f32 to vector<8x4xf32>
    %7 = arith.mulf %3, %6 : vector<8x4xf32>
    %cst_7 = arith.constant 3.125000e-02 : f32
    %8 = vector.broadcast %cst_7 : f32 to vector<8x4xf32>
    %9 = arith.mulf %5, %8 : vector<8x4xf32>
    %10 = arith.mulf %7, %7 : vector<8x4xf32>
    %11 = arith.subf %9, %10 : vector<8x4xf32>
    %cst_8 = arith.constant 0.000000e+00 : f32
    %12 = vector.broadcast %cst_8 : f32 to vector<8x4xf32>
    %13 = arith.maximumf %11, %12 : vector<8x4xf32>
    %cst_9 = arith.constant 9.99999974E-6 : f32
    %14 = vector.broadcast %cst_9 : f32 to vector<8x4xf32>
    %15 = arith.addf %13, %14 : vector<8x4xf32>
    %16 = math.rsqrt %15 : vector<8x4xf32>
    %cst_10 = arith.constant dense<0.000000e+00> : vector<8x128xf32>
    %17 = tpu.matmul %7, %2, %cst_10 {dimension_numbers = #tpu.dot_dimension_numbers<[1], [0], [0], [1], [0, 0, 1, 1], [], []>, precision = #tpu.contract_precision<fp32>} : vector<8x4xf32>, vector<4x128xf32>, vector<8x128xf32> -> vector<8x128xf32>
    %cst_11 = arith.constant dense<0.000000e+00> : vector<8x128xf32>
    %18 = tpu.matmul %16, %2, %cst_11 {dimension_numbers = #tpu.dot_dimension_numbers<[1], [0], [0], [1], [0, 0, 1, 1], [], []>, precision = #tpu.contract_precision<fp32>} : vector<8x4xf32>, vector<4x128xf32>, vector<8x128xf32> -> vector<8x128xf32>
    %19 = arith.subf %0, %17 : vector<8x128xf32>
    %20 = arith.mulf %19, %18 : vector<8x128xf32>
    %c0_12 = arith.constant 0 : index
    %c0_13 = arith.constant 0 : index
    %21 = vector.load %arg2[%c0_12, %c0_13] : memref<1x128xf32, #tpu.memory_space<vmem>>, vector<1x128xf32>
    %22 = vector.broadcast %21 : vector<1x128xf32> to vector<8x128xf32>
    %23 = arith.mulf %20, %22 : vector<8x128xf32>
    %c0_14 = arith.constant 0 : index
    %c0_15 = arith.constant 0 : index
    %24 = vector.load %arg3[%c0_14, %c0_15] : memref<1x128xf32, #tpu.memory_space<vmem>>, vector<1x128xf32>
    %25 = vector.broadcast %24 : vector<1x128xf32> to vector<8x128xf32>
    %26 = arith.addf %23, %25 : vector<8x128xf32>
    %c0_16 = arith.constant 0 : index
    %c0_17 = arith.constant 0 : index
    %27 = vector.load %arg6[%c0_16, %c0_17] : memref<8x128xf32, #tpu.memory_space<vmem>>, vector<8x128xf32>
    tpu.vector_store %arg6[%c0_16, %c0_17], %26 {strides = array<i32>} : memref<8x128xf32, #tpu.memory_space<vmem>>, vector<8x128xf32>,
    return
  }
  func.func @transform_0(%arg0: i32) -> (i32, i32) {
    %c0_i32 = arith.constant 0 : i32
    %c0_i32_0 = arith.constant 0 : i32
    return %arg0, %c0_i32 : i32, i32
  }
  func.func @transform_1(%arg0: i32) -> (i32, i32) {
    %c0_i32 = arith.constant 0 : i32
    %c0_i32_0 = arith.constant 0 : i32
    %c0_i32_1 = arith.constant 0 : i32
    return %c0_i32, %c0_i32_0 : i32, i32
  }
  func.func @transform_2(%arg0: i32) -> (i32, i32) {
    %c0_i32 = arith.constant 0 : i32
    %c0_i32_0 = arith.constant 0 : i32
    %c0_i32_1 = arith.constant 0 : i32
    return %c0_i32, %c0_i32_0 : i32, i32
  }
  func.func @transform_3(%arg0: i32) -> (i32, i32) {
    %c0_i32 = arith.constant 0 : i32
    %c0_i32_0 = arith.constant 0 : i32
    %c0_i32_1 = arith.constant 0 : i32
    return %c0_i32, %c0_i32_0 : i32, i32
  }
  func.func @transform_4(%arg0: i32) -> (i32, i32) {
    %c0_i32 = arith.constant 0 : i32
    %c0_i32_0 = arith.constant 0 : i32
    %c0_i32_1 = arith.constant 0 : i32
    return %c0_i32, %c0_i32_0 : i32, i32
  }
  func.func @transform_5(%arg0: i32) -> (i32, i32) {
    %c0_i32 = arith.constant 0 : i32
    %c0_i32_0 = arith.constant 0 : i32
    return %arg0, %c0_i32 : i32, i32
  }
}

</mosaic_0001>

<bundles_post_ra>
// kernel: tpu_custom_call.1
= control target key start
LH: loop header
LB: loop body
LE: loop exit
PB: predicated region body
PF: predicated region fallthrough
CT: control target
= control target key end

     0   :  { %10 = vsyncpa [#allocation3], 0  ;;  %v3337_v2 = vmov 0.0|0.0   ;;  %vm3338_vm0 = vmmov 0   ;;  %v3339_v11 = vmov 0.0   ;;  %vm1333_vm1 = vcmask 1043456   ;;  %s3852_s0 = inlined_call_operand.vmem [shape: f32[4,128], index: 0, kind: input, shape index: {}]   ;;  %s3853_s1 = inlined_call_operand.vmem [shape: f32[1,128], index: 1, kind: input, shape index: {}]   ;;  %s3854_s2 = inlined_call_operand.vmem [shape: f32[1,128], index: 2, kind: input, shape index: {}]   ;;  %s3855_s3 = inlined_call_operand.vmem [shape: f32[128,4], index: 3, kind: input, shape index: {}]   ;;  %s3856_s4 = inlined_call_operand.vmem [shape: f32[4,128], index: 4, kind: input, shape index: {}]   ;;  %s3857_s5 = inlined_call_operand.hbm [shape: f32[4,128], index: 5, kind: output, shape index: {}]  }
   0x1   :  { %v22_v0 = vld [vmem:[%s3855_s3] sm:$0xff]  ;;  %v23_v1 = vld [vmem:[%s3855_s3 + $0x8] sm:$0xff]  ;;  %2977 = vmatprep.subr.bf16.mxu0 %v3337_v2  ;;  %3121 = vmatprep.subr.bf16.mxu1 %v3337_v2  ;;  %v24_v5 = vld [vmem:[%s3855_s3 + $0x10] sm:$0xff]  ;;  %vm1329_vm2 = vcmask 31744  }
   0x2   :  { %v40_v3 = vand.u32 4294901760, %v22_v0  ;;  %v43_v4 = vand.u32 4294901760, %v23_v1  ;;  %v3387_v6 = vld [vmem:[%s3855_s3 + $0x18] sm:$0xff]  ;;  %v46_v7 = vand.u32 4294901760, %v24_v5  ;;  %v26_v9 = vld [vmem:[%s3855_s3 + $0x20] sm:$0xff]  ;;  %v3396_v10 = vld [vmem:[%s3855_s3 + $0x28] sm:$0xff]  ;;  %2529 = vmatprep.mubr.msk.f32.mxu0 %vm3338_vm0, %v3339_v11  ;;  %2739 = vmatprep.mubr.msk.f32.mxu1 %vm3338_vm0, %v3339_v11 }
   0x3   :  { %v49_v8 = vand.u32 4294901760, %v3387_v6  ;;  %v52_v14 = vand.u32 4294901760, %v26_v9  ;;  %v55_v15 = vand.u32 4294901760, %v3396_v10  ;;  %v3414_v16 = vld [vmem:[%s3855_s3 + $0x30] sm:$0xff]  ;;  %v3419_v17 = vld [vmem:[%s3855_s3 + $0x38] sm:$0xff]  ;;  %v3424_v18 = vld [vmem:[%s3852_s0] sm:$0xff] }
   0x4   :  { %v3402_v12 = vpack.c.bf16 %v43_v4, %v40_v3  ;;  %v58_v20 = vand.u32 4294901760, %v3414_v16  ;;  %v61_v21 = vand.u32 4294901760, %v3419_v17  ;;  %v30_v22 = vld [vmem:[%s3855_s3 + $0x40] sm:$0xff]  ;;  %v31_v23 = vld [vmem:[%s3855_s3 + $0x48] sm:$0xff]  ;;  %v680_v24 = vmul.f32 %v3424_v18, %v3424_v18  ;;  %v32_v28 = vld [vmem:[%s3855_s3 + $0x50] sm:$0xff] }
   0x5   :  { %v3406_v13 = vpack.c.bf16 %v49_v8, %v46_v7  ;;  %v3428_v19 = vpack.c.bf16 %v55_v15, %v52_v14  ;;  %v64_v25 = vand.u32 4294901760, %v30_v22  ;;  %v67_v26 = vand.u32 4294901760, %v31_v23  ;;  %v33_v29 = vld [vmem:[%s3855_s3 + $0x58] sm:$0xff]  ;;  %v34_v30 = vld [vmem:[%s3855_s3 + $0x60] sm:$0xff]  ;;  %v35_v32 = vld [vmem:[%s3855_s3 + $0x68] sm:$0xff] }
   0x6   :  { %2979 = vmatpush3.bf16.msra.mxu0 %v3402_v12  ;;  %3123 = vmatpush3.bf16.msra.mxu1 %v3402_v12  ;;  %v3444_v27 = vpack.c.bf16 %v61_v21, %v58_v20  ;;  %v3456_v31 = vand.u32 4294901760, %v3424_v18  ;;  %v36_v33 = vld [vmem:[%s3855_s3 + $0x70] sm:$0xff]  ;;  %v37_v34 = vld [vmem:[%s3855_s3 + $0x78] sm:$0xff]  ;;  %v3469_v35 = vsub.f32 %v22_v0, %v40_v3  ;;  %v3471_v36 = vsub.f32 %v23_v1, %v43_v4 }
   0x7   :  { %2980 = vmatprep.subr.bf16.mxu0 %v3337_v2  ;;  %3124 = vmatprep.subr.bf16.mxu1 %v3337_v2  ;;  %v3473_v37 = vsub.f32 %v24_v5, %v46_v7  ;;  %v3475_v38 = vand.u32 4294901760, %v680_v24  ;;  %v3477_v39 = vpack.c.bf16 %v67_v26, %v64_v25  ;;  %v70_v40 = vand.u32 4294901760, %v32_v28 }
   0x8   :  { %v73_v41 = vand.u32 4294901760, %v33_v29  ;;  %v76_v42 = vand.u32 4294901760, %v34_v30  ;;  %v79_v43 = vand.u32 4294901760, %v35_v32  ;;  %v82_v44 = vand.u32 4294901760, %v36_v33 }
   0x9   :  { %v85_v45 = vand.u32 4294901760, %v37_v34  ;;  %v3483_v46 = vsub.f32 %v3424_v18, %v3456_v31  ;;  %v133_v47 = vand.u32 4294901760, %v3469_v35  ;;  %v140_v48 = vand.u32 4294901760, %v3471_v36 }
   0xa   :  { %2982 = vmatpush3.bf16.msra.mxu0 %v3406_v13  ;;  %3126 = vmatpush3.bf16.msra.mxu1 %v3406_v13  ;;  %v147_v49 = vand.u32 4294901760, %v3473_v37  ;;  %v3491_v50 = vsub.f32 %v3387_v6, %v49_v8  ;;  %v3494_v51 = vsub.f32 %v680_v24, %v3475_v38  ;;  %v3496_v52 = vsub.f32 %v26_v9, %v52_v14 }
   0xb   :  { %2983 = vmatprep.subr.bf16.mxu0 %v3337_v2  ;;  %3127 = vmatprep.subr.bf16.mxu1 %v3337_v2  ;;  %v3498_v53 = vpack.c.bf16 %v73_v41, %v70_v40  ;;  %v3502_v54 = vpack.c.bf16 %v79_v43, %v76_v42  ;;  %v3504_v55 = vpack.c.bf16 %v85_v45, %v82_v44  ;;  %v3859_v56 = vand.u32 4294901760, %v3483_v46 }
   0xc   :  { %v3508_v57 = vsub.f32 %v3396_v10, %v55_v15  ;;  %v134_v58 = vsub.f32 %v3469_v35, %v133_v47  ;;  %v141_v59 = vsub.f32 %v3471_v36, %v140_v48  ;;  %v3515_v60 = vsub.f32 %v3473_v37, %v147_v49 }
   0xd   :  { %v154_v61 = vand.u32 4294901760, %v3491_v50  ;;  %v3858_v62 = vand.u32 4294901760, %v3494_v51  ;;  %v161_v63 = vand.u32 4294901760, %v3496_v52  ;;  %v3521_v0 = vsub.f32 %v3414_v16, %v58_v20 }
   0xe   :  { %2985 = vmatpush3.bf16.msra.mxu0 %v3428_v19  ;;  %3129 = vmatpush3.bf16.msra.mxu1 %v3428_v19  ;;  %v3524_v1 = vsub.f32 %v3419_v17, %v61_v21  ;;  %v3526_v3 = vsub.f32 %v30_v22, %v64_v25  ;;  %v3528_v4 = vsub.f32 %v31_v23, %v67_v26  ;;  %v168_v7 = vand.u32 4294901760, %v3508_v57 }
   0xf   :  { %2986 = vmatprep.subr.bf16.mxu0 %v3337_v2  ;;  %3130 = vmatprep.subr.bf16.mxu1 %v3337_v2  ;;  %v3530_v5 = vsub.f32 %v32_v28, %v70_v40  ;;  %v3532_v6 = vsub.f32 %v33_v29, %v73_v41  ;;  %v3537_v8 = vsub.f32 %v34_v30, %v76_v42  ;;  %v135_v15 = vand.u32 4294901760, %v134_v58 }
  0x10   :  { %v3539_v9 = vsub.f32 %v35_v32, %v79_v43  ;;  %v3541_v10 = vsub.f32 %v36_v33, %v82_v44  ;;  %v123_v14 = vsub.f32 %v3483_v46, %v3859_v56  ;;  %v142_v16 = vand.u32 4294901760, %v141_v59 }
  0x11   :  { %v3548_v17 = vsub.f32 %v37_v34, %v85_v45  ;;  %v765_v20 = vsub.f32 %v3494_v51, %v3858_v62  ;;  %v155_v21 = vsub.f32 %v3491_v50, %v154_v61  ;;  %v162_v22 = vsub.f32 %v3496_v52, %v161_v63 }
  0x12   :  { %2988 = vmatpush3.bf16.msra.mxu0 %v3444_v27  ;;  %3132 = vmatpush3.bf16.msra.mxu1 %v3444_v27  ;;  %v175_v23 = vand.u32 4294901760, %v3521_v0  ;;  %v182_v24 = vand.u32 4294901760, %v3524_v1  ;;  %v189_v25 = vand.u32 4294901760, %v3526_v3  ;;  %v196_v26 = vand.u32 4294901760, %v3528_v4 }
  0x13   :  { %2989 = vmatprep.subr.bf16.mxu0 %v3337_v2  ;;  %3133 = vmatprep.subr.bf16.mxu1 %v3337_v2  ;;  %v203_v28 = vand.u32 4294901760, %v3530_v5  ;;  %v210_v29 = vand.u32 4294901760, %v3532_v6  ;;  %v217_v30 = vand.u32 4294901760, %v3537_v8  ;;  %v224_v32 = vand.u32 4294901760, %v3539_v9 }
  0x14   :  { %v231_v33 = vand.u32 4294901760, %v3541_v10  ;;  %v3860_v34 = vand.u32 4294901760, %v3548_v17  ;;  %v3569_v40 = vpack.c.bf16 %v140_v48, %v133_v47  ;;  %v3571_v41 = vpack.c.bf16 %v154_v61, %v147_v49 }
  0x15   :  { %v3573_v42 = vpack.c.bf16 %v168_v7, %v161_v63  ;;  %v169_v43 = vsub.f32 %v3508_v57, %v168_v7  ;;  %v3576_v44 = vpack.c.bf16 %v182_v24, %v175_v23  ;;  %v3578_v45 = vpack.c.bf16 %v196_v26, %v189_v25 }
  0x16   :  { %2991 = vmatpush3.bf16.msra.mxu0 %v3477_v39  ;;  %3135 = vmatpush3.bf16.msra.mxu1 %v3477_v39  ;;  %v3580_v58 = vpack.c.bf16 %v210_v29, %v203_v28  ;;  %v124_v59 = vand.u32 4294901760, %v123_v14  ;;  %v766_v62 = vand.u32 4294901760, %v765_v20  ;;  %v3582_v56 = vpack.c.bf16 %v224_v32, %v217_v30 }
  0x17   :  { %2992 = vmatprep.subr.bf16.mxu0 %v3337_v2  ;;  %3136 = vmatprep.subr.bf16.mxu1 %v3337_v2  ;;  %v3588_v47 = vpack.c.bf16 %v3860_v34, %v231_v33  ;;  %v3002_v48 = vpack.c.bf16 %v142_v16, %v135_v15  ;;  %v149_v49 = vand.u32 4294901760, %v3515_v60  ;;  %v156_v61 = vand.u32 4294901760, %v155_v21 }
  0x18   :  { %v163_v63 = vand.u32 4294901760, %v162_v22  ;;  %v170_v7 = vand.u32 4294901760, %v169_v43  ;;  %v176_v20 = vsub.f32 %v3521_v0, %v175_v23  ;;  %v183_v34 = vsub.f32 %v3524_v1, %v182_v24 }
  0x19   :  { %v3005_v14 = vpack.c.bf16 %v156_v61, %v149_v49  ;;  %v190_v16 = vsub.f32 %v3526_v3, %v189_v25  ;;  %v197_v21 = vsub.f32 %v3528_v4, %v196_v26  ;;  %v204_v22 = vsub.f32 %v3530_v5, %v203_v28 }
  0x1a   :  { %2994 = vmatpush3.bf16.msra.mxu0 %v3498_v53  ;;  %3138 = vmatpush3.bf16.msra.mxu1 %v3498_v53  ;;  %v3008_v60 = vpack.c.bf16 %v170_v7, %v163_v63  ;;  %v184_v15 = vand.u32 4294901760, %v183_v34  ;;  %v218_v25 = vsub.f32 %v3537_v8, %v217_v30  ;;  %v225_v28 = vsub.f32 %v3539_v9, %v224_v32 }
  0x1b   :  { %2995 = vmatprep.subr.bf16.mxu0 %v3337_v2  ;;  %3139 = vmatprep.subr.bf16.mxu1 %v3337_v2  ;;  %v191_v24 = vand.u32 4294901760, %v190_v16  ;;  %v198_v43 = vand.u32 4294901760, %v197_v21  ;;  %v205_v34 = vand.u32 4294901760, %v204_v22  ;;  %v232_v30 = vsub.f32 %v3541_v10, %v231_v33 }
  0x1c   :  { %v219_v49 = vand.u32 4294901760, %v218_v25  ;;  %v226_v61 = vand.u32 4294901760, %v225_v28  ;;  %v3861_v63 = vand.u32 4294901760, %v3548_v17  ;;  %v2268_v25 = vld [vmem:[%s3854_s2] ss:$0 sm:$0xff] }
  0x1d   :  { %v3014_v26 = vpack.c.bf16 %v198_v43, %v191_v24  ;;  %v2267_v24 = vld [vmem:[%s3853_s1] ss:$0 sm:$0xff] }
  0x1e   :  { %2997 = vmatpush3.bf16.msra.mxu0 %v3502_v54  ;;  %3141 = vmatpush3.bf16.msra.mxu1 %v3502_v54  ;;  %v239_v7 = vsub.f32 %v3548_v17, %v3861_v63  ;;  %v3020_v32 = vpack.c.bf16 %v226_v61, %v219_v49 }
  0x1f   :  { %2998 = vmatprep.subr.bf16.mxu0 %v3337_v2  ;;  %3142 = vmatprep.subr.bf16.mxu1 %v3337_v2 }
  0x22   :  { %3000 = vmatpush3.bf16.msra.mxu0 %v3504_v55  ;;  %3144 = vmatpush3.bf16.msra.mxu1 %v3504_v55 }
  0x23   :  { %3001 = vmatprep.subr.bf16.mxu0 %v3337_v2  ;;  %3145 = vmatprep.subr.bf16.mxu1 %v3337_v2 }
  0x25   :  { %2530 = vmatmul.mubr.f32.vlgmr.msra.gmra.mrb[0].mxu0 %v124_v59  ;;  %2740 = vmatmul.mubr.f32.vlgmr.msra.gmra.mrb[0].mxu1 %v766_v62  ;;  %v177_v62 = vand.u32 4294901760, %v176_v20  ;;  %v211_v59 = vsub.f32 %v3532_v6, %v210_v29  ;;  %v240_v20 = vand.u32 4294901760, %v239_v7 }
  0x26   :  { %3003 = vmatpush3.bf16.msra.mxu0 %v3002_v48  ;;  %3147 = vmatpush3.bf16.msra.mxu1 %v3002_v48 }
  0x27   :  { %3004 = vmatprep.subr.bf16.mxu0 %v3337_v2  ;;  %3148 = vmatprep.subr.bf16.mxu1 %v3337_v2  ;;  %v3011_v23 = vpack.c.bf16 %v184_v15, %v177_v62  ;;  %v212_v48 = vand.u32 4294901760, %v211_v59  ;;  %v3029_v62 = vpack.c.bf16 %v3491_v50, %v3473_v37  ;;  %v3038_v37 = vpack.c.bf16 %v3528_v4, %v3526_v3 }
  0x28   :  { %2564 = vmatprep.mubr.msk.f32.mxu0 %vm3338_vm0, %v3339_v11  ;;  %2774 = vmatprep.mubr.msk.f32.mxu1 %vm3338_vm0, %v3339_v11  ;;  %v3041_v50 = vpack.c.bf16 %v3532_v6, %v3530_v5 }
  0x29   :  { %v3017_v29 = vpack.c.bf16 %v212_v48, %v205_v34 }
  0x2a   :  { %3006 = vmatpush3.bf16.msra.mxu0 %v3005_v14  ;;  %3150 = vmatpush3.bf16.msra.mxu1 %v3005_v14  ;;  %v233_v14 = vand.u32 4294901760, %v232_v30 }
  0x2b   :  { %3007 = vmatprep.subr.bf16.mxu0 %v3337_v2  ;;  %3151 = vmatprep.subr.bf16.mxu1 %v3337_v2 }
  0x2c   :  { %v3023_v33 = vpack.c.bf16 %v240_v20, %v233_v14 }
  0x2e   :  { %3009 = vmatpush3.bf16.msra.mxu0 %v3008_v60  ;;  %3153 = vmatpush3.bf16.msra.mxu1 %v3008_v60  ;;  %v3026_v60 = vpack.c.bf16 %v3471_v36, %v3469_v35  ;;  %v3032_v35 = vpack.c.bf16 %v3508_v57, %v3496_v52  ;;  %v3035_v36 = vpack.c.bf16 %v3524_v1, %v3521_v0  ;;  %v3862_v0 = vand.u32 4294901760, %v3483_v46 }
  0x2f   :  { %3010 = vmatprep.subr.bf16.mxu0 %v3337_v2  ;;  %3154 = vmatprep.subr.bf16.mxu1 %v3337_v2  ;;  %v3044_v52 = vpack.c.bf16 %v3539_v9, %v3537_v8  ;;  %v3047_v57 = vpack.c.bf16 %v3548_v17, %v3541_v10  ;;  %v3863_v1 = vand.u32 4294901760, %v3494_v51 }
  0x32   :  { %3012 = vmatpush3.bf16.msra.mxu0 %v3011_v23  ;;  %3156 = vmatpush3.bf16.msra.mxu1 %v3011_v23 }
  0x33   :  { %3013 = vmatprep.subr.bf16.mxu0 %v3337_v2  ;;  %3157 = vmatprep.subr.bf16.mxu1 %v3337_v2 }
  0x36   :  { %3015 = vmatpush3.bf16.msra.mxu0 %v3014_v26  ;;  %3159 = vmatpush3.bf16.msra.mxu1 %v3014_v26 }
  0x37   :  { %3016 = vmatprep.subr.bf16.mxu0 %v3337_v2  ;;  %3160 = vmatprep.subr.bf16.mxu1 %v3337_v2 }
  0x3a   :  { %3018 = vmatpush3.bf16.msra.mxu0 %v3017_v29  ;;  %3162 = vmatpush3.bf16.msra.mxu1 %v3017_v29 }
  0x3b   :  { %3019 = vmatprep.subr.bf16.mxu0 %v3337_v2  ;;  %3163 = vmatprep.subr.bf16.mxu1 %v3337_v2 }
  0x3e   :  { %3021 = vmatpush3.bf16.msra.mxu0 %v3020_v32  ;;  %3165 = vmatpush3.bf16.msra.mxu1 %v3020_v32 }
  0x3f   :  { %3022 = vmatprep.subr.bf16.mxu0 %v3337_v2  ;;  %3166 = vmatprep.subr.bf16.mxu1 %v3337_v2 }
  0x42   :  { %3024 = vmatpush3.bf16.msra.mxu0 %v3023_v33  ;;  %3168 = vmatpush3.bf16.msra.mxu1 %v3023_v33 }
  0x43   :  { %3025 = vmatprep.subr.bf16.mxu0 %v3337_v2  ;;  %3169 = vmatprep.subr.bf16.mxu1 %v3337_v2 }
  0x45   :  { %2565 = vmatmul.mubr.f32.vlgmr.msra.gmra.mrb[0].mxu0 %v3456_v31  ;;  %2775 = vmatmul.mubr.f32.vlgmr.msra.gmra.mrb[0].mxu1 %v3475_v38 }
  0x46   :  { %3027 = vmatpush3.bf16.msra.mxu0 %v3026_v60  ;;  %3171 = vmatpush3.bf16.msra.mxu1 %v3026_v60 }
  0x47   :  { %3028 = vmatprep.subr.bf16.mxu0 %v3337_v2  ;;  %3172 = vmatprep.subr.bf16.mxu1 %v3337_v2 }
  0x48   :  { %2599 = vmatprep.mubr.msk.f32.mxu0 %vm3338_vm0, %v3339_v11  ;;  %2809 = vmatprep.mubr.msk.f32.mxu1 %vm3338_vm0, %v3339_v11 }
  0x4a   :  { %3030 = vmatpush3.bf16.msra.mxu0 %v3029_v62  ;;  %3174 = vmatpush3.bf16.msra.mxu1 %v3029_v62 }
  0x4b   :  { %3031 = vmatprep.subr.bf16.mxu0 %v3337_v2  ;;  %3175 = vmatprep.subr.bf16.mxu1 %v3337_v2 }
  0x4e   :  { %3033 = vmatpush3.bf16.msra.mxu0 %v3032_v35  ;;  %3177 = vmatpush3.bf16.msra.mxu1 %v3032_v35 }
  0x4f   :  { %3034 = vmatprep.subr.bf16.mxu0 %v3337_v2  ;;  %3178 = vmatprep.subr.bf16.mxu1 %v3337_v2 }
  0x52   :  { %3036 = vmatpush3.bf16.msra.mxu0 %v3035_v36  ;;  %3180 = vmatpush3.bf16.msra.mxu1 %v3035_v36 }
  0x53   :  { %3037 = vmatprep.subr.bf16.mxu0 %v3337_v2  ;;  %3181 = vmatprep.subr.bf16.mxu1 %v3337_v2 }
  0x56   :  { %3039 = vmatpush3.bf16.msra.mxu0 %v3038_v37  ;;  %3183 = vmatpush3.bf16.msra.mxu1 %v3038_v37 }
  0x57   :  { %3040 = vmatprep.subr.bf16.mxu0 %v3337_v2  ;;  %3184 = vmatprep.subr.bf16.mxu1 %v3337_v2 }
  0x5a   :  { %3042 = vmatpush3.bf16.msra.mxu0 %v3041_v50  ;;  %3186 = vmatpush3.bf16.msra.mxu1 %v3041_v50 }
  0x5b   :  { %3043 = vmatprep.subr.bf16.mxu0 %v3337_v2  ;;  %3187 = vmatprep.subr.bf16.mxu1 %v3337_v2 }
  0x5e   :  { %3045 = vmatpush3.bf16.msra.mxu0 %v3044_v52  ;;  %3189 = vmatpush3.bf16.msra.mxu1 %v3044_v52 }
  0x5f   :  { %3046 = vmatprep.subr.bf16.mxu0 %v3337_v2  ;;  %3190 = vmatprep.subr.bf16.mxu1 %v3337_v2 }
  0x62   :  { %3048 = vmatpush3.bf16.msra.mxu0 %v3047_v57  ;;  %3192 = vmatpush3.bf16.msra.mxu1 %v3047_v57 }
  0x63   :  { %3049 = vmatprep.subr.bf16.mxu0 %v3337_v2  ;;  %3193 = vmatprep.subr.bf16.mxu1 %v3337_v2 }
  0x65   :  { %2600 = vmatmul.mubr.f32.vlgmr.msra.gmra.mrb[0].mxu0 %v3483_v46  ;;  %2810 = vmatmul.mubr.f32.vlgmr.msra.gmra.mrb[0].mxu1 %v3494_v51 }
  0x66   :  { %3051 = vmatpush3.bf16.msra.mxu0 %v3402_v12  ;;  %3195 = vmatpush3.bf16.msra.mxu1 %v3402_v12 }
  0x67   :  { %3052 = vmatprep.subr.bf16.mxu0 %v3337_v2  ;;  %3196 = vmatprep.subr.bf16.mxu1 %v3337_v2 }
  0x68   :  { %2634 = vmatprep.mubr.msk.f32.mxu0 %vm3338_vm0, %v3339_v11  ;;  %2844 = vmatprep.mubr.msk.f32.mxu1 %vm3338_vm0, %v3339_v11 }
  0x6a   :  { %3054 = vmatpush3.bf16.msra.mxu0 %v3406_v13  ;;  %3198 = vmatpush3.bf16.msra.mxu1 %v3406_v13 }
  0x6b   :  { %3055 = vmatprep.subr.bf16.mxu0 %v3337_v2  ;;  %3199 = vmatprep.subr.bf16.mxu1 %v3337_v2 }
  0x6e   :  { %3057 = vmatpush3.bf16.msra.mxu0 %v3428_v19  ;;  %3201 = vmatpush3.bf16.msra.mxu1 %v3428_v19 }
  0x6f   :  { %3058 = vmatprep.subr.bf16.mxu0 %v3337_v2  ;;  %3202 = vmatprep.subr.bf16.mxu1 %v3337_v2 }
  0x72   :  { %3060 = vmatpush3.bf16.msra.mxu0 %v3444_v27  ;;  %3204 = vmatpush3.bf16.msra.mxu1 %v3444_v27 }
  0x73   :  { %3061 = vmatprep.subr.bf16.mxu0 %v3337_v2  ;;  %3205 = vmatprep.subr.bf16.mxu1 %v3337_v2 }
  0x76   :  { %3063 = vmatpush3.bf16.msra.mxu0 %v3477_v39  ;;  %3207 = vmatpush3.bf16.msra.mxu1 %v3477_v39 }
  0x77   :  { %3064 = vmatprep.subr.bf16.mxu0 %v3337_v2  ;;  %3208 = vmatprep.subr.bf16.mxu1 %v3337_v2 }
  0x7a   :  { %3066 = vmatpush3.bf16.msra.mxu0 %v3498_v53  ;;  %3210 = vmatpush3.bf16.msra.mxu1 %v3498_v53 }
  0x7b   :  { %3067 = vmatprep.subr.bf16.mxu0 %v3337_v2  ;;  %3211 = vmatprep.subr.bf16.mxu1 %v3337_v2 }
  0x7e   :  { %3069 = vmatpush3.bf16.msra.mxu0 %v3502_v54  ;;  %3213 = vmatpush3.bf16.msra.mxu1 %v3502_v54 }
  0x7f   :  { %3070 = vmatprep.subr.bf16.mxu0 %v3337_v2  ;;  %3214 = vmatprep.subr.bf16.mxu1 %v3337_v2 }
  0x82   :  { %3072 = vmatpush3.bf16.msra.mxu0 %v3504_v55  ;;  %3216 = vmatpush3.bf16.msra.mxu1 %v3504_v55 }
  0x83   :  { %3073 = vmatprep.subr.bf16.mxu0 %v3337_v2  ;;  %3217 = vmatprep.subr.bf16.mxu1 %v3337_v2 }
  0x85   :  { %2635 = vmatmul.mubr.f32.vlgmr.msra.gmra.mrb[0].mxu0 %v3862_v0  ;;  %2845 = vmatmul.mubr.f32.vlgmr.msra.gmra.mrb[0].mxu1 %v3863_v1 }
  0x86   :  { %3075 = vmatpush3.bf16.msra.mxu0 %v3569_v40  ;;  %3219 = vmatpush3.bf16.msra.mxu1 %v3569_v40 }
  0x87   :  { %3076 = vmatprep.subr.bf16.mxu0 %v3337_v2  ;;  %3220 = vmatprep.subr.bf16.mxu1 %v3337_v2 }
  0x88   :  { %2669 = vmatprep.mubr.msk.f32.mxu0 %vm3338_vm0, %v3339_v11  ;;  %2879 = vmatprep.mubr.msk.f32.mxu1 %vm3338_vm0, %v3339_v11 }
  0x8a   :  { %3078 = vmatpush3.bf16.msra.mxu0 %v3571_v41  ;;  %3222 = vmatpush3.bf16.msra.mxu1 %v3571_v41 }
  0x8b   :  { %3079 = vmatprep.subr.bf16.mxu0 %v3337_v2  ;;  %3223 = vmatprep.subr.bf16.mxu1 %v3337_v2 }
  0x8e   :  { %3081 = vmatpush3.bf16.msra.mxu0 %v3573_v42  ;;  %3225 = vmatpush3.bf16.msra.mxu1 %v3573_v42 }
  0x8f   :  { %3082 = vmatprep.subr.bf16.mxu0 %v3337_v2  ;;  %3226 = vmatprep.subr.bf16.mxu1 %v3337_v2 }
  0x92   :  { %3084 = vmatpush3.bf16.msra.mxu0 %v3576_v44  ;;  %3228 = vmatpush3.bf16.msra.mxu1 %v3576_v44 }
  0x93   :  { %3085 = vmatprep.subr.bf16.mxu0 %v3337_v2  ;;  %3229 = vmatprep.subr.bf16.mxu1 %v3337_v2 }
  0x96   :  { %3087 = vmatpush3.bf16.msra.mxu0 %v3578_v45  ;;  %3231 = vmatpush3.bf16.msra.mxu1 %v3578_v45 }
  0x97   :  { %3088 = vmatprep.subr.bf16.mxu0 %v3337_v2  ;;  %3232 = vmatprep.subr.bf16.mxu1 %v3337_v2 }
  0x9a   :  { %3090 = vmatpush3.bf16.msra.mxu0 %v3580_v58  ;;  %3234 = vmatpush3.bf16.msra.mxu1 %v3580_v58 }
  0x9b   :  { %3091 = vmatprep.subr.bf16.mxu0 %v3337_v2  ;;  %3235 = vmatprep.subr.bf16.mxu1 %v3337_v2 }
  0x9e   :  { %3093 = vmatpush3.bf16.msra.mxu0 %v3582_v56  ;;  %3237 = vmatpush3.bf16.msra.mxu1 %v3582_v56 }
  0x9f   :  { %3094 = vmatprep.subr.bf16.mxu0 %v3337_v2  ;;  %3238 = vmatprep.subr.bf16.mxu1 %v3337_v2 }
  0xa2   :  { %3096 = vmatpush3.bf16.msra.mxu0 %v3588_v47  ;;  %3240 = vmatpush3.bf16.msra.mxu1 %v3588_v47 }
  0xa3   :  { %3097 = vmatprep.subr.bf16.mxu0 %v3337_v2  ;;  %3241 = vmatprep.subr.bf16.mxu1 %v3337_v2 }
  0xa5   :  { %2670 = vmatmul.mubr.f32.vlgmr.msra.gmra.mrb[0].mxu0 %v3456_v31  ;;  %2880 = vmatmul.mubr.f32.vlgmr.msra.gmra.mrb[0].mxu1 %v3475_v38 }
  0xa6   :  { %3099 = vmatpush3.bf16.msra.mxu0 %v3402_v12  ;;  %3243 = vmatpush3.bf16.msra.mxu1 %v3402_v12 }
  0xa7   :  { %3100 = vmatprep.subr.bf16.mxu0 %v3337_v2  ;;  %3244 = vmatprep.subr.bf16.mxu1 %v3337_v2 }
  0xa8   :  { %2704 = vmatprep.mubr.msk.f32.mxu0 %vm3338_vm0, %v3339_v11  ;;  %2914 = vmatprep.mubr.msk.f32.mxu1 %vm3338_vm0, %v3339_v11 }
  0xaa   :  { %3102 = vmatpush3.bf16.msra.mxu0 %v3406_v13  ;;  %3246 = vmatpush3.bf16.msra.mxu1 %v3406_v13 }
  0xab   :  { %3103 = vmatprep.subr.bf16.mxu0 %v3337_v2  ;;  %3247 = vmatprep.subr.bf16.mxu1 %v3337_v2 }
  0xae   :  { %3105 = vmatpush3.bf16.msra.mxu0 %v3428_v19  ;;  %3249 = vmatpush3.bf16.msra.mxu1 %v3428_v19 }
  0xaf   :  { %3106 = vmatprep.subr.bf16.mxu0 %v3337_v2  ;;  %3250 = vmatprep.subr.bf16.mxu1 %v3337_v2 }
  0xb2   :  { %3108 = vmatpush3.bf16.msra.mxu0 %v3444_v27  ;;  %3252 = vmatpush3.bf16.msra.mxu1 %v3444_v27 }
  0xb3   :  { %3109 = vmatprep.subr.bf16.mxu0 %v3337_v2  ;;  %3253 = vmatprep.subr.bf16.mxu1 %v3337_v2 }
  0xb6   :  { %3111 = vmatpush3.bf16.msra.mxu0 %v3477_v39  ;;  %3255 = vmatpush3.bf16.msra.mxu1 %v3477_v39 }
  0xb7   :  { %3112 = vmatprep.subr.bf16.mxu0 %v3337_v2  ;;  %3256 = vmatprep.subr.bf16.mxu1 %v3337_v2 }
  0xba   :  { %3114 = vmatpush3.bf16.msra.mxu0 %v3498_v53  ;;  %3258 = vmatpush3.bf16.msra.mxu1 %v3498_v53 }
  0xbb   :  { %3115 = vmatprep.subr.bf16.mxu0 %v3337_v2  ;;  %3259 = vmatprep.subr.bf16.mxu1 %v3337_v2 }
  0xbe   :  { %3117 = vmatpush3.bf16.msra.mxu0 %v3502_v54  ;;  %3261 = vmatpush3.bf16.msra.mxu1 %v3502_v54 }
  0xbf   :  { %3118 = vmatprep.subr.bf16.mxu0 %v3337_v2  ;;  %3262 = vmatprep.subr.bf16.mxu1 %v3337_v2  ;;  %v38_v2 = vld [vmem:[%s3856_s4] sm:$0xf] }
  0xc0   :  { %v1335_v12 = vsel %vm1333_vm1, %v38_v2, 0 }
  0xc1   :  { %v3792_v13 = vand.u32 4294901760, %v1335_v12 }
  0xc2   :  { %3120 = vmatpush3.bf16.msra.mxu0 %v3504_v55  ;;  %3264 = vmatpush3.bf16.msra.mxu1 %v3504_v55 }
  0xc3   :  { %2917 = vmatprep.subr.mxu0 %v3339_v11  ;;  %2947 = vmatprep.subr.mxu1 %v3339_v11  ;;  %v1415_v19 = vsub.f32 %v1335_v12, %v3792_v13 }
  0xc5   :  { %2705 = vmatmul.mubr.f32.vlgmr.msra.gmra.mrb[0].mxu0 %v3456_v31  ;;  %2915 = vmatmul.mubr.f32.vlgmr.msra.gmra.mrb[0].mxu1 %v3475_v38  ;;  %v1416_v55 = vand.u32 4294901760, %v1415_v19 }
  0xc6   :  { %2919 = vmatprep.mubr.msk.f32.mxu0 %vm3338_vm0, %v3339_v11  ;;  %2949 = vmatprep.mubr.msk.f32.mxu1 %vm3338_vm0, %v3339_v11 }
  0xc7   :  { %2918 = vmatpush3.msra.mxu0 %v3792_v13  ;;  %2948 = vmatpush3.msra.mxu1 %v3792_v13  ;;  %v1417_v6 = vsub.f32 %v1415_v19, %v1416_v55 }
  0xc8   :  { %2922 = vmatprep.subr.mxu0 %v3339_v11  ;;  %2952 = vmatprep.subr.mxu1 %v3339_v11 }
  0xc9   :  { %v1418_v17 = vand.u32 4294901760, %v1417_v6 }
 0x198   :  { %v676_v27 = vpop.f32.mrb[0].mxu0  ;;  %v1318_v31 = vpop.f32.mrb[0].mxu1 }
 0x199   :  { %v1322_v38 = vmul.f32 0.03125, %v676_v27  ;;  %v2706_v39 = vpop.f32.mrb[1].mxu0  ;;  %v2916_v46 = vpop.f32.mrb[1].mxu1  ;;  %v1323_v54 = vmul.f32 0.03125, %v1318_v31 }
 0x19b   :  { %v1324_v51 = vmul.f32 %v1322_v38, %v1322_v38  ;;  %v1331_v53 = vsel %vm1329_vm2, %v1322_v38, 0 }
 0x19c   :  { %v1403_v56 = vand.u32 4294901760, %v1331_v53 }
 0x19d   :  { %v1325_v3 = vsub.f32 %v1323_v54, %v1324_v51 }
 0x19e   :  { %v1404_v4 = vsub.f32 %v1331_v53, %v1403_v56 }
 0x19f   :  { %v1326_v5 = vmax.f32 %v1325_v3, 0.0 }
 0x1a0   :  { %v1405_v8 = vand.u32 4294901760, %v1404_v4 }
 0x1a1   :  { %v1327_v9 = vadd.f32 1e-05, %v1326_v5 }
 0x1a2   :  { %v1406_v10 = vsub.f32 %v1404_v4, %v1405_v8 }
 0x1a3   :  { %3311 = vrsqrt.f32 %v1327_v9 }
 0x1a4   :  { %v1407_v40 = vand.u32 4294901760, %v1406_v10 }
 0x1a6   :  { %2920 = vmatmul.mubr.f32.vlgmr.msra.gmra.mrb[2].mxu0 %v1407_v40 }
 0x1a7   :  { %2923 = vmatpush3.msra.mxu0 %v1418_v17  ;;  %2924 = vmatprep.mubr.msk.f32.mxu0 %vm3338_vm0, %v3339_v11 }
 0x1a8   :  { %2927 = vmatprep.subr.mxu0 %v3339_v11 }
 0x1ad   :  { %v3312_v41 = vpop.eup %3311 }
 0x1ae   :  { %2925 = vmatmul.mubr.f32.vlgmr.msra.gmra.mrb[2].mxu0 %v1403_v56  ;;  %v1784_v42 = vsel %vm1329_vm2, %v3312_v41, 0 }
 0x1af   :  { %2928 = vmatpush3.msra.mxu0 %v1415_v19  ;;  %2929 = vmatprep.mubr.msk.f32.mxu0 %vm3338_vm0, %v3339_v11  ;;  %v1852_v44 = vand.u32 4294901760, %v1784_v42 }
 0x1b0   :  { %2932 = vmatprep.subr.mxu0 %v3339_v11 }
 0x1b1   :  { %v1853_v45 = vsub.f32 %v1784_v42, %v1852_v44 }
 0x1b3   :  { %v1854_v58 = vand.u32 4294901760, %v1853_v45 }
 0x1b5   :  { %v1855_v47 = vsub.f32 %v1853_v45, %v1854_v58 }
 0x1b6   :  { %2930 = vmatmul.mubr.f32.vlgmr.msra.gmra.mrb[2].mxu0 %v1404_v4 }
 0x1b7   :  { %v1856_v15 = vand.u32 4294901760, %v1855_v47  ;;  %2933 = vmatpush3.msra.mxu0 %v3792_v13  ;;  %2934 = vmatprep.mubr.msk.f32.mxu0 %vm3338_vm0, %v3339_v11 }
 0x1b8   :  { %2937 = vmatprep.subr.mxu0 %v3339_v11 }
 0x1b9   :  { %2950 = vmatmul.mubr.f32.vlgmr.msra.gmra.mrb[2].mxu1 %v1856_v15 }
 0x1ba   :  { %2953 = vmatpush3.msra.mxu1 %v1418_v17  ;;  %2954 = vmatprep.mubr.msk.f32.mxu1 %vm3338_vm0, %v3339_v11 }
 0x1bb   :  { %2957 = vmatprep.subr.mxu1 %v3339_v11 }
 0x1be   :  { %2935 = vmatmul.mubr.f32.vlgmr.msra.gmra.mrb[2].mxu0 %v1405_v8 }
 0x1bf   :  { %2938 = vmatpush3.msra.mxu0 %v1416_v55  ;;  %2939 = vmatprep.mubr.msk.f32.mxu0 %vm3338_vm0, %v3339_v11 }
 0x1c0   :  { %2942 = vmatprep.subr.mxu0 %v3339_v11 }
 0x1c1   :  { %2955 = vmatmul.mubr.f32.vlgmr.msra.gmra.mrb[2].mxu1 %v1852_v44 }
 0x1c2   :  { %2958 = vmatpush3.msra.mxu1 %v1415_v19  ;;  %2959 = vmatprep.mubr.msk.f32.mxu1 %vm3338_vm0, %v3339_v11 }
 0x1c3   :  { %2962 = vmatprep.subr.mxu1 %v3339_v11 }
 0x1c6   :  { %2940 = vmatmul.mubr.f32.vlgmr.msra.gmra.mrb[2].mxu0 %v1403_v56 }
 0x1c7   :  { %2943 = vmatpush3.msra.mxu0 %v3792_v13  ;;  %2944 = vmatprep.mubr.msk.f32.mxu0 %vm3338_vm0, %v3339_v11 }
 0x1c9   :  { %2960 = vmatmul.mubr.f32.vlgmr.msra.gmra.mrb[2].mxu1 %v1853_v45 }
 0x1ca   :  { %2963 = vmatpush3.msra.mxu1 %v3792_v13  ;;  %2964 = vmatprep.mubr.msk.f32.mxu1 %vm3338_vm0, %v3339_v11 }
 0x1cb   :  { %2967 = vmatprep.subr.mxu1 %v3339_v11 }
 0x1ce   :  { %2945 = vmatmul.mubr.f32.vlgmr.msra.gmra.mrb[2].mxu0 %v1403_v56 }
 0x1d1   :  { %2965 = vmatmul.mubr.f32.vlgmr.msra.gmra.mrb[2].mxu1 %v1854_v58 }
 0x1d2   :  { %2968 = vmatpush3.msra.mxu1 %v1416_v55  ;;  %2969 = vmatprep.mubr.msk.f32.mxu1 %vm3338_vm0, %v3339_v11 }
 0x1d3   :  { %2972 = vmatprep.subr.mxu1 %v3339_v11 }
 0x1d9   :  { %2970 = vmatmul.mubr.f32.vlgmr.msra.gmra.mrb[2].mxu1 %v1852_v44 }
 0x1da   :  { %2973 = vmatpush3.msra.mxu1 %v3792_v13  ;;  %2974 = vmatprep.mubr.msk.f32.mxu1 %vm3338_vm0, %v3339_v11 }
 0x1e1   :  { %2975 = vmatmul.mubr.f32.vlgmr.msra.gmra.mrb[2].mxu1 %v1852_v44 }
 0x2a1   :  { %v1779_v16 = vpop.f32.mrb[2].mxu0 }
 0x2a2   :  { %v2946_v21 = vpop.f32.mrb[3].mxu0  ;;  %v2232_v22 = vsub.f32 %v3424_v18, %v1779_v16 }
 0x2b4   :  { %v2228_v23 = vpop.f32.mrb[2].mxu1 }
 0x2b5   :  { %v2233_v43 = vmul.f32 %v2232_v22, %v2228_v23  ;;  %v2976_v59 = vpop.f32.mrb[3].mxu1 }
 0x2b7   :  { %v2241_v26 = vmul.f32 %v2267_v24, %v2233_v43 }
 0x2b9   :  { %v2249_v34 = vadd.f32 %v2268_v25, %v2241_v26 }
 0x2bb   :  { %2250 = vst [vmem:[#allocation2] sm:$0xff] %v2249_v34 }
 0x2bc   :  { %2255 = vsyncadd [#allocation3], 64  ;;  %s3340_s30 = smov [#allocation2]  }
 0x2bd   :  { %s2256_s6 = sshll.u32 %s3340_s30, 4  ;;  %s2257_s6 = int_to_ptr.vmem [resolvable:$true] %s2256_s6 }
 0x2be   :  { %s3313_s7 = scalar_lea.vmem %s2257_s6, 64  ;;  %s3317_s8 = scalar_lea.vmem %s2257_s6, 128 }
 0x2bf   :  { %p3314_p0 = scmp.ne.s32.totalorder %s2257_s6, %s3313_s7  ;;  %p3318_p1 = scmp.lt.s32.totalorder %s2257_s6, %s2257_s6 }
 0x2c0   :  { %p3319_p2 = scmp.lt.s32.totalorder %s3317_s8, %s3313_s7 }
 0x2c2   :  { %p3320_p3 = por %p3319_p2, %p3318_p1 }
 0x2c4   :  { %p3321_p4 = pnand %p3320_p3, %p3314_p0 }
 0x2c6   :  { %3324 = shalt.err (!%p3321_p4)
}
 0x2c7   :  { %s3325_s10 = scalar_lea.hbm %s3857_s5, 64 }
 0x2c8   :  { %p3326_p5 = scmp.ne.s32.totalorder %s3857_s5, %s3325_s10  ;;  %p3329_p6 = scmp.lt.u32.totalorder %s3325_s10, %s3857_s5 }
 0x2ca   :  { %p3331_p7 = pnand %p3329_p6, %p3326_p5 }
 0x2cc   :  { %3334 = shalt.err (!%p3331_p7)
}
 0x2cd   :  { %s3341_s14 = smov 64   ;;  %s3342_s0 = smov 4  }
 0x2ce   :  { %2262 = dma.vmem_to_hbm [thread:$0]  %s2257_s6, 64, %s3857_s5, [#allocation3], %s3341_s14, %s3341_s14, %s3342_s0  }
 0x2cf   :  { %3335 = dma.done.wait [#allocation3], 128  }
 0x2d0   :  { %3336 = vsyncadd [#allocation3], 4294967168 }
 0x2d1   :  { %2266 = vsyncpa [#allocation3], 1 }

</bundles_post_ra>
